<compile_context>
chip_gen: v7x
topology: tpu7x:2x2x1
jax: 0.10.0
libtpu: 0.0.40
codegen_flags: <defaults>
</compile_context>

<pallas_src>
import functools

import jax
import jax.numpy as jnp
import numpy as np
from jax.experimental import pallas as pl
from jax.experimental.pallas import tpu as pltpu


def _conv_bn_relu_kernel(a_ref, w_ref, b_ref, o_ref, acc_ref):
    """One (t_oc, t_hw) output tile; K reduction is the innermost grid axis.

    a_ref:   (1, t_k, t_hw) bf16  K-major im2col patch tile
    w_ref:   (t_oc, t_k)    bf16  conv weights with eval-mode BN scale folded
    b_ref:   (t_oc, 1)      f32   folded BN bias
    o_ref:   (1, t_oc, t_hw)      output tile (bf16 by default)
    acc_ref: (t_oc, t_hw)   f32   VMEM accumulator across the K grid axis
    """
    ki = pl.program_id(3)

    @pl.when(ki == 0)
    def _():
        acc_ref[...] = jnp.zeros_like(acc_ref)

    acc_ref[...] += jax.lax.dot_general(
        w_ref[...], a_ref[0],
        dimension_numbers=(((1,), (0,)), ((), ())),   # (OC, K) x (K, HW)
        preferred_element_type=jnp.float32)

    @pl.when(ki == pl.num_programs(3) - 1)
    def _():
        o_ref[0] = jnp.maximum(acc_ref[...] + b_ref[...], 0.0).astype(o_ref.dtype)


def _im2col_kmajor(x, kh, kw, stride, padding):
    """x: [N,C,H,W] -> patches [N, C*KH*KW, OH*OW] (K-major, transpose-free).

    K-column order is c*KH*KW + i*KW + j, matching torch weight.reshape(OC, -1).
    """
    n, c, h, w = x.shape
    oh = (h + 2 * padding - kh) // stride + 1
    ow = (w + 2 * padding - kw) // stride + 1
    xp = jnp.pad(x, ((0, 0), (0, 0), (padding, padding), (padding, padding)))
    taps = []
    for i in range(kh):
        for j in range(kw):
            taps.append(xp[:, :, i:i + (oh - 1) * stride + 1:stride,
                                 j:j + (ow - 1) * stride + 1:stride])
    p = jnp.stack(taps, axis=2)                       # [N, C, KH*KW, OH, OW]
    return p.reshape(n, c * kh * kw, oh * ow), oh, ow  # contiguous -> free


def _vmem_capacity_bytes():
    try:
        return int(pltpu.get_tpu_info().vmem_capacity_bytes)
    except Exception:
        return 64 * 1024 * 1024          # conservative (v7x-sized) fallback


def _round_up(x, m):
    return (x + m - 1) // m * m


def _pick_tiles(hw_pad, k_dim, oc, out_bytes, budget_bytes):
    """(t_oc, t_k, t_hw) whose per-grid-step VMEM footprint fits the budget.

    Honest estimate: weight block counted double-buffered (Mosaic allocates two
    buffers even for grid-invariant blocks) plus the f32 accumulator scratch.
    """
    t_oc = oc if oc <= 512 else 256          # OC grid axis only for big layers
    t_k = k_dim if k_dim <= 2048 else 1024   # K reduction axis only when big

    def est(t_hw):
        return (2 * t_k * t_hw * 2            # bf16 A tile, double-buffered
                + 2 * t_oc * t_hw * out_bytes  # output tile, double-buffered
                + 2 * t_oc * t_k * 2           # bf16 weight tile, double-buffered
                + 2 * t_oc * 4                 # bias
                + t_oc * t_hw * 4)             # f32 accumulator scratch

    for cand in (2048, 1024, 512, 256, 128):
        if hw_pad % cand == 0 and est(cand) <= budget_bytes:
            return t_oc, t_k, cand
    return t_oc, t_k, 128                     # hw_pad is always a 128-multiple


@functools.partial(jax.jit, static_argnames=("stride", "padding", "out_dtype"))
def bn_conv2d(x, weight, gamma, beta, running_mean=None, running_var=None, *,
              stride, padding, out_dtype=jnp.bfloat16):
    """Forward of BN_Conv2d: Conv2d(bias=False) -> BatchNorm2d(eval) -> ReLU.

    x:      [N, C, H, W]    float32 (NCHW)
    weight: [OC, C, KH, KW] float32 (PyTorch conv weight layout)
    gamma, beta: [OC]       BN affine params
    running_mean/var: [OC]  optional; default 0 / 1 (fresh nn.BatchNorm2d)
    returns [N, OC, OH, OW] in out_dtype (bf16 by default)
    """
    n, c, _, _ = x.shape
    oc, _, kh, kw = weight.shape
    eps = 1e-5
    if running_mean is None:
        running_mean = jnp.zeros((oc,), jnp.float32)
    if running_var is None:
        running_var = jnp.ones((oc,), jnp.float32)

    # K-major, transpose-free im2col in bf16 (halves patch-expansion traffic).
    patches, oh, ow = _im2col_kmajor(x.astype(jnp.bfloat16), kh, kw, stride,
                                     padding)                  # [N, K, HW]
    hw = oh * ow
    k_dim = c * kh * kw

    # Fold eval-mode BN into the weights / per-channel bias.
    scale = gamma / jnp.sqrt(running_var + eps)                # [OC]
    w_mat = (weight.reshape(oc, k_dim) * scale[:, None]).astype(jnp.bfloat16)
    bias = (beta - running_mean * scale).astype(jnp.float32).reshape(oc, 1)

    # Generation-aware VMEM budget (v5e/v6e: 128 MiB, v7x: 64 MiB per core).
    vmem_cap = _vmem_capacity_bytes()
    if vmem_cap >= 96 * 1024 * 1024:
        vmem_limit, budget = 100 * 1024 * 1024, 72 * 1024 * 1024
    else:
        vmem_limit, budget = 44 * 1024 * 1024, 30 * 1024 * 1024

    out_bytes = np.dtype(out_dtype).itemsize

    # Zero-pad OH*OW to a lane-dense multiple so every store is an unmasked
    # full-lane vst; padded columns are sliced off afterwards.
    q = 256 if hw >= 256 else 128
    hw_pad = _round_up(hw, q)

    t_oc, t_k, t_hw = _pick_tiles(hw_pad, k_dim, oc, out_bytes, budget)
    oc_pad = _round_up(oc, t_oc)
    k_pad = _round_up(k_dim, t_k)

    # Megacore occupancy: keep at least 2 parallel grid steps (v7x has 2 TCs).
    while n * (oc_pad // t_oc) * (hw_pad // t_hw) < 2 and t_hw > 128:
        t_hw //= 2

    if hw_pad != hw or k_pad != k_dim:
        patches = jnp.pad(patches,
                          ((0, 0), (0, k_pad - k_dim), (0, hw_pad - hw)))
    if oc_pad != oc or k_pad != k_dim:
        w_mat = jnp.pad(w_mat, ((0, oc_pad - oc), (0, k_pad - k_dim)))
    if oc_pad != oc:
        bias = jnp.pad(bias, ((0, oc_pad - oc), (0, 0)))

    grid = (n, oc_pad // t_oc, hw_pad // t_hw, k_pad // t_k)

    cost = pl.CostEstimate(
        flops=2 * n * hw_pad * k_pad * oc_pad,
        transcendentals=0,
        bytes_accessed=(patches.size * 2 + w_mat.size * 2 + bias.size * 4
                        + n * oc_pad * hw_pad * out_bytes))

    out = pl.pallas_call(
        _conv_bn_relu_kernel,
        out_shape=jax.ShapeDtypeStruct((n, oc_pad, hw_pad), out_dtype),
        grid_spec=pltpu.PrefetchScalarGridSpec(
            num_scalar_prefetch=0,
            grid=grid,
            in_specs=[
                # K-major patch tile: lane-dense on the spatial axis.
                pl.BlockSpec((1, t_k, t_hw), lambda ni, oi, hi, ki: (ni, ki, hi)),
                pl.BlockSpec((t_oc, t_k), lambda ni, oi, hi, ki: (oi, ki)),
                pl.BlockSpec((t_oc, 1), lambda ni, oi, hi, ki: (oi, 0)),
            ],
            out_specs=pl.BlockSpec((1, t_oc, t_hw),
                                   lambda ni, oi, hi, ki: (ni, oi, hi)),
            scratch_shapes=[pltpu.VMEM((t_oc, t_hw), jnp.float32)],
        ),
        compiler_params=pltpu.CompilerParams(
            dimension_semantics=("parallel", "parallel", "parallel", "arbitrary"),
            vmem_limit_bytes=vmem_limit),
        cost_estimate=cost,
    )(patches, w_mat, bias)

    # [N, OC, OH*OW] is already channel-major; slicing off the zero padding and
    # the final NCHW reshape are no-ops for aligned shapes.
    out = out[:, :oc, :hw]
    return out.reshape(n, oc, oh, ow)


def _conv_ref(x, weight, stride, padding):
    return jax.lax.conv_general_dilated(
        x, weight, window_strides=(stride, stride),
        padding=[(padding, padding), (padding, padding)],
        dimension_numbers=("NCHW", "OIHW", "NCHW"),
        precision=jax.lax.Precision.HIGHEST)


if __name__ == "__main__":
    key = jax.random.PRNGKey(0)
    k_x, k_w, k_g, k_b = jax.random.split(key, 4)

    # BN_Conv2d(in_channels=4, out_channels=8, kernel_size=3, stride=1, padding=1)
    N, C, H, W = 2, 4, 16, 16
    OC, KH, KW = 8, 3, 3
    stride, padding = 1, 1

    x = jax.random.normal(k_x, (N, C, H, W), dtype=jnp.float32)
    weight = jax.random.normal(k_w, (OC, C, KH, KW), dtype=jnp.float32) * 0.1
    gamma = 1.0 + 0.1 * jax.random.normal(k_g, (OC,), dtype=jnp.float32)
    beta = 0.1 * jax.random.normal(k_b, (OC,), dtype=jnp.float32)

    out_bf16 = jax.block_until_ready(
        bn_conv2d(x, weight, gamma, beta, stride=stride, padding=padding))
    out_f32 = jax.block_until_ready(
        bn_conv2d(x, weight, gamma, beta, stride=stride, padding=padding,
                  out_dtype=jnp.float32))

    eps = 1e-5
    scale = gamma / jnp.sqrt(1.0 + eps)

    # Tight check: reference with the same bf16 operand rounding as the kernel.
    x_r = x.astype(jnp.bfloat16).astype(jnp.float32)
    w_r = (weight * scale[:, None, None, None]).astype(jnp.bfloat16).astype(
        jnp.float32)
    ref_bf16_ops = jnp.maximum(
        _conv_ref(x_r, w_r, stride, padding) + beta[None, :, None, None], 0.0)
    np.testing.assert_allclose(np.asarray(out_f32), np.asarray(ref_bf16_ops),
                               rtol=1e-4, atol=1e-4)
    np.testing.assert_allclose(np.asarray(out_bf16.astype(jnp.float32)),
                               np.asarray(ref_bf16_ops), rtol=2e-2, atol=2e-2)

    # Loose check vs exact f32 module semantics (bf16 MXU operands -> ~1e-3 err).
    ref_f32 = jnp.maximum(
        _conv_ref(x, weight, stride, padding) * scale[None, :, None, None]
        + beta[None, :, None, None], 0.0)
    np.testing.assert_allclose(np.asarray(out_f32), np.asarray(ref_f32),
                               rtol=5e-2, atol=5e-2)

    print("KERNEL_OK")
</pallas_src>

<mosaic_0001>
module attributes {stable_mosaic.version = 11 : i64} {
  func.func @_conv_bn_relu_kernel(%arg0: i32, %arg1: i32, %arg2: i32, %arg3: i32, %arg4: memref<1x36x256xbf16, #tpu.memory_space<vmem>>, %arg5: memref<8x36xbf16, #tpu.memory_space<vmem>>, %arg6: memref<8x1xf32, #tpu.memory_space<vmem>>, %arg7: memref<1x8x256xbf16, #tpu.memory_space<vmem>>, %arg8: memref<8x256xf32, #tpu.memory_space<vmem>>) attributes {dimension_semantics = [#tpu.dimension_semantics<parallel>, #tpu.dimension_semantics<parallel>, #tpu.dimension_semantics<parallel>, #tpu.dimension_semantics<arbitrary>], iteration_bounds = array<i64: 2, 1, 1, 1>, scalar_prefetch = 0 : i64, scratch_operands = 1 : i64, tpu.core_type = #tpu.core_type<tc>, window_params = [{transform_indices = @transform_0, window_bounds = array<i64: 1, 36, 256>}, {transform_indices = @transform_1, window_bounds = array<i64: 8, 36>}, {transform_indices = @transform_2, window_bounds = array<i64: 8, 1>}, {transform_indices = @transform_3, window_bounds = array<i64: 1, 8, 256>}]} {
    %c0_i32 = arith.constant 0 : i32
    %0 = arith.cmpi eq, %arg3, %c0_i32 : i32
    %1 = arith.extui %0 : i1 to i32
    %c0_i32_0 = arith.constant 0 : i32
    %2 = arith.cmpi ne, %1, %c0_i32_0 : i32
    scf.if %2 {
      %cst_11 = arith.constant 0.000000e+00 : f32
      %13 = vector.broadcast %cst_11 : f32 to vector<8x256xf32>
      %c0_12 = arith.constant 0 : index
      %c0_13 = arith.constant 0 : index
      %14 = vector.load %arg8[%c0_12, %c0_13] : memref<8x256xf32, #tpu.memory_space<vmem>>, vector<8x256xf32>
      tpu.vector_store %arg8[%c0_12, %c0_13], %13 {strides = array<i32>} : memref<8x256xf32, #tpu.memory_space<vmem>>, vector<8x256xf32>,
    } else {
    }
    %c0 = arith.constant 0 : index
    %c0_1 = arith.constant 0 : index
    %3 = vector.load %arg8[%c0, %c0_1] : memref<8x256xf32, #tpu.memory_space<vmem>>, vector<8x256xf32>
    %c0_2 = arith.constant 0 : index
    %c0_3 = arith.constant 0 : index
    %4 = vector.load %arg5[%c0_2, %c0_3] : memref<8x36xbf16, #tpu.memory_space<vmem>>, vector<8x36xbf16>
    %c0_4 = arith.constant 0 : index
    %c0_5 = arith.constant 0 : index
    %c0_6 = arith.constant 0 : index
    %5 = vector.load %arg4[%c0_4, %c0_5, %c0_6] : memref<1x36x256xbf16, #tpu.memory_space<vmem>>, vector<1x36x256xbf16>
    %6 = vector.shape_cast %5 : vector<1x36x256xbf16> to vector<36x256xbf16>
    %cst = arith.constant dense<0.000000e+00> : vector<8x256xf32>
    %7 = tpu.matmul %4, %6, %cst {dimension_numbers = #tpu.dot_dimension_numbers<[1], [0], [0], [1], [0, 0, 1, 1], [], []>} : vector<8x36xbf16>, vector<36x256xbf16>, vector<8x256xf32> -> vector<8x256xf32>
    %8 = arith.addf %3, %7 : vector<8x256xf32>
    %c0_7 = arith.constant 0 : index
    %c0_8 = arith.constant 0 : index
    %9 = vector.load %arg8[%c0_7, %c0_8] : memref<8x256xf32, #tpu.memory_space<vmem>>, vector<8x256xf32>
    tpu.vector_store %arg8[%c0_7, %c0_8], %8 {strides = array<i32>} : memref<8x256xf32, #tpu.memory_space<vmem>>, vector<8x256xf32>,
    %c0_i32_9 = arith.constant 0 : i32
    %10 = arith.cmpi eq, %arg3, %c0_i32_9 : i32
    %11 = arith.extui %10 : i1 to i32
    %c0_i32_10 = arith.constant 0 : i32
    %12 = arith.cmpi ne, %11, %c0_i32_10 : i32
    scf.if %12 {
      %c0_11 = arith.constant 0 : index
      %c0_12 = arith.constant 0 : index
      %13 = vector.load %arg8[%c0_11, %c0_12] : memref<8x256xf32, #tpu.memory_space<vmem>>, vector<8x256xf32>
      %c0_13 = arith.constant 0 : index
      %c0_14 = arith.constant 0 : index
      %14 = vector.load %arg6[%c0_13, %c0_14] : memref<8x1xf32, #tpu.memory_space<vmem>>, vector<8x1xf32>
      %15 = vector.broadcast %14 : vector<8x1xf32> to vector<8x256xf32>
      %16 = arith.addf %13, %15 : vector<8x256xf32>
      %cst_15 = arith.constant 0.000000e+00 : f32
      %17 = vector.broadcast %cst_15 : f32 to vector<8x256xf32>
      %18 = arith.maximumf %16, %17 : vector<8x256xf32>
      %19 = arith.truncf %18 : vector<8x256xf32> to vector<8x256xbf16>
      %c0_16 = arith.constant 0 : index
      %c0_17 = arith.constant 0 : index
      %c0_18 = arith.constant 0 : index
      %20 = vector.load %arg7[%c0_16, %c0_17, %c0_18] : memref<1x8x256xbf16, #tpu.memory_space<vmem>>, vector<1x8x256xbf16>
      %21 = vector.shape_cast %20 : vector<1x8x256xbf16> to vector<8x256xbf16>
      %22 = vector.shape_cast %19 : vector<8x256xbf16> to vector<1x8x256xbf16>
      tpu.vector_store %arg7[%c0_16, %c0_17, %c0_18], %22 {strides = array<i32>} : memref<1x8x256xbf16, #tpu.memory_space<vmem>>, vector<1x8x256xbf16>,
    } else {
    }
    return
  }
  func.func @transform_0(%arg0: i32, %arg1: i32, %arg2: i32, %arg3: i32) -> (i32, i32, i32) {
    %c0_i32 = arith.constant 0 : i32
    return %arg0, %arg3, %arg2 : i32, i32, i32
  }
  func.func @transform_1(%arg0: i32, %arg1: i32, %arg2: i32, %arg3: i32) -> (i32, i32) {
    %c0_i32 = arith.constant 0 : i32
    return %arg1, %arg3 : i32, i32
  }
  func.func @transform_2(%arg0: i32, %arg1: i32, %arg2: i32, %arg3: i32) -> (i32, i32) {
    %c0_i32 = arith.constant 0 : i32
    %c0_i32_0 = arith.constant 0 : i32
    return %arg1, %c0_i32 : i32, i32
  }
  func.func @transform_3(%arg0: i32, %arg1: i32, %arg2: i32, %arg3: i32) -> (i32, i32, i32) {
    %c0_i32 = arith.constant 0 : i32
    return %arg0, %arg1, %arg2 : i32, i32, i32
  }
}

</mosaic_0001>

<bundles_post_ra>
// kernel: bn_conv2d.1
= control target key start
LH: loop header
LB: loop body
LE: loop exit
PB: predicated region body
PF: predicated region fallthrough
CT: control target
= control target key end

     0   :  { %s669_s12 = smov 0   ;;  %s671_s13 = smov 0   ;;  %s712_s0 = inlined_call_operand.vmem [shape: bf16[2,36,256], index: 0, kind: input, shape index: {}]   ;;  %s713_s1 = inlined_call_operand.vmem [shape: bf16[8,36], index: 1, kind: input, shape index: {}]   ;;  %s714_s2 = inlined_call_operand.vmem [shape: f32[8,1], index: 2, kind: input, shape index: {}]   ;;  %s715_s3 = inlined_call_operand.vmem [shape: bf16[2,8,256], index: 3, kind: output, shape index: {}]  }
   0x1   :  { %s673_s14 = smov 0  }
   0x2 LB: > { %s39_s15 = sadd.s32 1, %s642_s13  ;;  %p572_p0 = scmp.ge.s32.totalorder %s646_s14, 1  ;;  %s646_s14 = sphi %s673_s14, %s13_s14   ;;  %s642_s13 = sphi %s671_s13, %s717_s13   ;;  %s638_s12 = sphi %s669_s12, %s716_s12  }
   0x3   : > { %p41_p1 = scmp.ge.s32.totalorder %s39_s15, 2  ;;  %p205_p2 = scmp.lt.s32.totalorder %s646_s14, 3 }
   0x5   : > { %s719_s15 = smov (%p41_p1, %s39_s15), 0  ;;  %p206_p3 = pnand %p572_p0, %p205_p2 }
   0x6   : > { %p259_p4 = scmp.lt.s32.totalorder (!%p206_p3), %s638_s12, 1  ;;  %v648_v0 = vmov (!%p206_p3), 0   ;;  %v399_v1 = vld [vmem:[%s714_s2] sm:$0xff] (!%p206_p3)  ;;  %vm342_vm0 = vcmask (!%p206_p3), 1041408   ;;  %vm338_vm1 = vcmask (!%p206_p3), 293888  }
   0x7   : > { %209 = sbr.rel (%p206_p3) target bundleno = 251 (0xfb), region = 32  ;;  %381 = vmatprep.mubr.bf16.mxu0 (!%p206_p3), %v648_v0  ;;  %615 = vset.pattern.permute.xlu0 (!%p206_p3), %v648_v0  ;;  %v307_v10 = vld [vmem:[%s713_s1] sm:$0xf] (!%p206_p3) }
   0x8   : > { %402 = vperm.xlu0 (!%p206_p3), %615, %v399_v1  }
   0xe   : > { %s721_s12 = smov (!%p259_p4, %s638_s12), 1 }
   0xf   : > { %s589_s18 = smul.u32 40, %s721_s12  ;;  %s587_s24 = sshll.u32 %s721_s12, 3 }
  0x10   : > { %s296_s27 = scalar_lea.vmem %s715_s3, %s587_s24 }
  0x11   : > { %s270_s21 = scalar_lea.vmem %s712_s0, %s589_s18 }
  0x12   : > { %v616_v2 = vld [vmem:[%s270_s21 + $0x4] ss:$8 sps:$4 sm:$0xff]   ;;  %v618_v3 = vld [vmem:[%s270_s21] ss:$8 sps:$4 sm:$0xff]   ;;  %v619_v4 = vld [vmem:[%s270_s21 + $0x14] ss:$8 sps:$4 sm:$0xff]  }
  0x13   : > { %349 = vmatprep.subr.bf16.mxu0 %v616_v2  ;;  %v312_v5 = vld [vmem:[%s270_s21 + $0x20] sm:$0x33]  ;;  %v621_v6 = vld [vmem:[%s270_s21 + $0x10] ss:$8 sps:$4 sm:$0xff]  }
  0x14   : > { %350 = vmatpush1.bf16.msra.mxu0 %v618_v3  ;;  %v581_v7 = vcombine.high %v312_v5, %v312_v5  ;;  %v580_v8 = vcombine.low %v312_v5, %v312_v5 }
  0x15   : > { %351 = vmatprep.subr.bf16.mxu0 %v619_v4 }
  0x16   : > { %v344_v9 = vsel %vm342_vm0, %v580_v8, 0 }
  0x18   : > { %352 = vmatpush1.bf16.msra.mxu0 %v621_v6 }
  0x19   : > { %582 = vmatprep.subr.msk.bf16.mxu0 %vm342_vm0, %v581_v7 }
  0x1c   : > { %354 = vmatpush1.bf16.msra.mxu0 %v344_v9 }
  0x1f   : > { %583 = vmatmul.mubr.msk.bf16.vlgmr.msra.gmra.mrb[0].mxu0 %vm338_vm1, %v307_v10 }
  0x87   : > { %v403_v11 = vpop.permute.xlu0 %402 }
  0xf2   : > { %v383_v12 = vpop.f32.mrb[0].mxu0 }
  0xf3   : > { %v405_v13 = vadd.f32 %v403_v11, %v383_v12  ;;  %v385_v14 = vpop.f32.mrb[1].mxu0 }
  0xf4   : > { %v406_v15 = vadd.f32 %v403_v11, %v385_v14  ;;  %v387_v16 = vpop.f32.mrb[2].mxu0 }
  0xf5   : > { %v407_v17 = vmax.f32 %v405_v13, 0.0  ;;  %v388_v18 = vpop.f32.mrb[3].mxu0 }
  0xf6   : > { %v408_v19 = vmax.f32 %v406_v15, 0.0 }
  0xf8   : > { %v588_v20 = vpack.c.bf16 %v408_v19, %v407_v17 }
  0xfa   : > { %417 = vst [vmem:[%s296_s27] sm:$0xff] %v588_v20 }
  0xfb PF: > { %s13_s14 = sadd.s32 1, %s646_s14   ;;  %s716_s12 = smov %s642_s13 }
  0xfc   : > { %p10_p5 = scmp.ge.s32.totalorder %s13_s14, 4   ;;  %s717_s13 = smov %s719_s15 }
  0xfe   :  { %12 = sbr.rel (!%p10_p5) target bundleno = 2 (0x2), region = 76 }

</bundles_post_ra>
